<compile_context>
chip_gen: v6e
topology: v6e:2x2x1
jax: 0.10.0
libtpu: 0.0.40
codegen_flags: <defaults>
</compile_context>

<pallas_src>
import math
import numpy as np
import jax
import jax.numpy as jnp
from jax.experimental import pallas as pl
from jax.experimental.pallas import tpu as pltpu

W_DTYPE = jnp.bfloat16          # MXU-friendly weight / matmul-operand dtype
A_DTYPE = jnp.bfloat16          # activation dtype in HBM (gx, y_fwd, y_bwd)
VMEM_LIMIT = 48 * 1024 * 1024   # below v7x's 64 MiB physical VMEM


def _round_up(n, m):
    return ((n + m - 1) // m) * m


# ----------------------------------------------------------------------------
# Row-tiled dense kernel:  acc = sum_j x_j @ w_j + b  [ -> log_softmax ]
# then split acc column-wise into one or more outputs.
# ----------------------------------------------------------------------------
def _make_dense_kernel(n_in, out_dims, log_softmax, valid_cols):
    n_out = len(out_dims)
    offs = [0]
    for d in out_dims:
        offs.append(offs[-1] + d)

    def kernel(*refs):
        x_refs = refs[:n_in]
        w_refs = refs[n_in:2 * n_in]
        b_ref = refs[2 * n_in]
        o_refs = refs[2 * n_in + 1:2 * n_in + 1 + n_out]

        acc = None
        for j in range(n_in):
            w = w_refs[j][...]                                # (Dj, K) bf16
            d = jnp.dot(x_refs[j][...].astype(w.dtype), w,
                        preferred_element_type=jnp.float32)   # (tm, K) f32
            acc = d if acc is None else acc + d
        acc = acc + b_ref[...]                                # bias in f32

        if log_softmax:
            K = acc.shape[-1]
            if valid_cols is not None and valid_cols < K:
                col = jax.lax.broadcasted_iota(jnp.int32, acc.shape, 1)
                acc = jnp.where(col < valid_cols, acc, jnp.float32(-1e30))
            m = jnp.max(acc, axis=-1, keepdims=True)
            s = acc - m
            acc = s - jnp.log(jnp.sum(jnp.exp(s), axis=-1, keepdims=True))

        for h in range(n_out):
            o_refs[h][...] = acc[:, offs[h]:offs[h + 1]].astype(o_refs[h].dtype)

    return kernel


def _dense(inputs, weights, bias, out_dims, out_dtypes,
           log_softmax=False, valid_cols=None, row_tile=256):
    """Row-tiled Pallas dense with multiple column-split outputs."""
    n_in = len(inputs)
    N = inputs[0].shape[0]
    tm = min(row_tile, _round_up(N, 8))
    Np = _round_up(N, tm)
    if Np != N:
        inputs = [jnp.pad(xx, ((0, Np - N), (0, 0))) for xx in inputs]

    in_specs = ([pl.BlockSpec((tm, xx.shape[1]), lambda i: (i, 0)) for xx in inputs]
                + [pl.BlockSpec(ww.shape, lambda i: (0, 0)) for ww in weights]
                + [pl.BlockSpec(bias.shape, lambda i: (0, 0))])
    out_specs = tuple(pl.BlockSpec((tm, d), lambda i: (i, 0)) for d in out_dims)
    out_shape = tuple(jax.ShapeDtypeStruct((Np, d), dt)
                      for d, dt in zip(out_dims, out_dtypes))

    outs = pl.pallas_call(
        _make_dense_kernel(n_in, out_dims, log_softmax, valid_cols),
        out_shape=out_shape,
        grid=(Np // tm,),
        in_specs=in_specs,
        out_specs=out_specs,
        compiler_params=pltpu.CompilerParams(
            dimension_semantics=("parallel",),
            vmem_limit_bytes=VMEM_LIMIT),
    )(*inputs, *weights, bias)
    if not isinstance(outs, (list, tuple)):
        outs = (outs,)
    return [o[:N] for o in outs]


# ----------------------------------------------------------------------------
# Fused fwd+bwd LSTM recurrence.  Time loop == grid; gx / y streamed per step.
# ----------------------------------------------------------------------------
def bilstm_recurrent_kernel(gx_f_ref, gx_b_ref, whh_ref, len_ref,
                            yf_ref, yb_ref, h_sc, c_sc):
    """One timestep of both directions.

    gx_f_ref : (1, B, 4H) bf16  precomputed x@W_ih^T + b, fwd dir, time t
    gx_b_ref : (1, B, 4H) bf16  same for bwd dir, time T-1-t (via index_map)
    whh_ref  : (2H, 8H)  bf16   block-diagonal [W_hh_f, 0; 0, W_hh_b] (transposed)
    len_ref  : (B, 1)    int32  valid lengths
    yf/yb    : (1, B, H) bf16   per-direction outputs (zero at padded steps)
    h_sc/c_sc: (B, 2H)   f32    carries, fwd in [:, :H], bwd in [:, H:]
    Gate order within each 4H block is (i, f, o, g).
    """
    t = pl.program_id(0)
    nt = pl.num_programs(0)
    B, H2 = h_sc.shape
    H = H2 // 2

    @pl.when(t == 0)
    def _init():
        h_sc[...] = jnp.zeros_like(h_sc)
        c_sc[...] = jnp.zeros_like(c_sc)

    lengths = len_ref[...]                       # (B, 1) int32
    w = whh_ref[...]                             # (2H, 8H) bf16
    h_prev = h_sc[...]                           # (B, 2H) f32
    c_prev = c_sc[...]

    # One fused block-diagonal recurrent matmul covers both directions.
    g_h = jnp.dot(h_prev.astype(w.dtype), w,
                  preferred_element_type=jnp.float32)   # (B, 8H) f32

    def half_cell(gates, h_p, c_p, mask):
        # gate order (i, f, o, g): one sigmoid over 3H, one tanh over H.
        s3 = jax.nn.sigmoid(gates[:, :3 * H])
        i_g = s3[:, :H]
        f_g = s3[:, H:2 * H]
        o_g = s3[:, 2 * H:]
        g_g = jnp.tanh(gates[:, 3 * H:])
        c_new = f_g * c_p + i_g * g_g
        h_new = o_g * jnp.tanh(c_new)
        h_out = jnp.where(mask, h_new, h_p)      # freeze carry past length
        c_out = jnp.where(mask, c_new, c_p)
        y_out = jnp.where(mask, h_new, jnp.float32(0.0))
        return h_out, c_out, y_out

    # forward direction, timestep t
    gates_f = gx_f_ref[0].astype(jnp.float32) + g_h[:, :4 * H]
    mask_f = t < lengths                                      # (B, 1) bool
    hf, cf, yf = half_cell(gates_f, h_prev[:, :H], c_prev[:, :H], mask_f)

    # backward direction, timestep nt-1-t
    gates_b = gx_b_ref[0].astype(jnp.float32) + g_h[:, 4 * H:]
    mask_b = (nt - 1 - t) < lengths
    hb, cb, yb = half_cell(gates_b, h_prev[:, H:], c_prev[:, H:], mask_b)

    h_sc[:, :H] = hf
    h_sc[:, H:] = hb
    c_sc[:, :H] = cf
    c_sc[:, H:] = cb
    yf_ref[0] = yf.astype(yf_ref.dtype)
    yb_ref[0] = yb.astype(yb_ref.dtype)


def bilstm_layer(inputs_tm, lengths_2d, layer_p, H):
    """One bidirectional LSTM layer. inputs_tm: list of time-major (T, B, Di)."""
    T, B = inputs_tm[0].shape[:2]
    flat = [f.reshape(T * B, f.shape[-1]) for f in inputs_tm]

    # Input projection for BOTH directions in one big matmul (hoisted off the
    # serial critical path); biases (b_ih + b_hh) folded in; bf16 outputs.
    gx_f, gx_b = _dense(flat, layer_p["wih_list"], layer_p["b"],
                        out_dims=[4 * H, 4 * H],
                        out_dtypes=[A_DTYPE, A_DTYPE])
    gx_f = gx_f.reshape(T, B, 4 * H)
    gx_b = gx_b.reshape(T, B, 4 * H)

    nt = T
    yf, yb = pl.pallas_call(
        bilstm_recurrent_kernel,
        out_shape=(jax.ShapeDtypeStruct((T, B, H), A_DTYPE),
                   jax.ShapeDtypeStruct((T, B, H), A_DTYPE)),
        grid=(T,),
        in_specs=[pl.BlockSpec((1, B, 4 * H), lambda t: (t, 0, 0)),
                  pl.BlockSpec((1, B, 4 * H), lambda t: (nt - 1 - t, 0, 0)),
                  pl.BlockSpec((2 * H, 8 * H), lambda t: (0, 0)),
                  pl.BlockSpec((B, 1), lambda t: (0, 0))],
        out_specs=(pl.BlockSpec((1, B, H), lambda t: (t, 0, 0)),
                   pl.BlockSpec((1, B, H), lambda t: (nt - 1 - t, 0, 0))),
        scratch_shapes=[pltpu.VMEM((B, 2 * H), jnp.float32),
                        pltpu.VMEM((B, 2 * H), jnp.float32)],
        compiler_params=pltpu.CompilerParams(
            dimension_semantics=("arbitrary",),
            vmem_limit_bytes=VMEM_LIMIT),
    )(gx_f, gx_b, layer_p["whh_blk"], lengths_2d)
    return [yf, yb]


def main_model_forward(x, lengths, params):
    """x: (B, T, embed_dim); lengths: host-concrete int array (PyTorch's
    pack_padded_sequence calls .tolist(), so lengths are host values)."""
    lengths_np = np.asarray(lengths)
    T = int(lengths_np.max())                    # pad_packed_sequence semantics
    B = x.shape[0]
    H = params["hidden_dim"]
    C = params["num_classes"]

    # Pad batch up to the sublane width; padded rows get length 0 (all-masked).
    Bp = max(8, _round_up(B, 8))
    x_use = x[:, :T].astype(A_DTYPE)
    if Bp != B:
        x_use = jnp.pad(x_use, ((0, Bp - B), (0, 0), (0, 0)))
    lengths_pad = np.zeros((Bp,), np.int32)
    lengths_pad[:B] = lengths_np
    lengths_2d = jnp.asarray(lengths_pad).reshape(Bp, 1)

    x_tm = jnp.transpose(x_use, (1, 0, 2))       # (T, Bp, E): one small transpose

    # TODO(synk): dropout_input / dropout_lstm / dropout_FC are identity (eval).
    feats = [x_tm]                               # becomes [y_fwd, y_bwd] after layer 0
    for layer_p in params["lstm"]:
        feats = bilstm_layer(feats, lengths_2d, layer_p, H)

    # Classifier: Linear(2H -> C) + log_softmax, lane-dense (Cp >= 128) output,
    # reading y_fwd / y_bwd directly (no HBM concatenate).
    flat = [f.reshape(T * Bp, H) for f in feats]
    Cp = params["fc"]["w_list"][0].shape[1]
    (logp,) = _dense(flat, params["fc"]["w_list"], params["fc"]["b"],
                     out_dims=[Cp], out_dtypes=[jnp.float32],
                     log_softmax=True, valid_cols=C)
    logp = logp.reshape(T, Bp, Cp)[:, :B, :C]
    return jnp.transpose(logp, (1, 0, 2))        # (B, T, C)


# ----------------------------------------------------------------------------
# Deterministic parameter init (matches PyTorch shapes; synthetic values).
# Gate order is generated directly in the permuted (i, f, o, g) layout.
# ----------------------------------------------------------------------------
def init_params(key, embed_dim, hidden_dim, num_layers, num_classes, w_dtype=W_DTYPE):
    def unif(k, shape, scale):
        return jax.random.uniform(k, shape, jnp.float32, -scale, scale)

    H = hidden_dim
    stdv = 1.0 / math.sqrt(H)
    lstm = []
    for layer in range(num_layers):
        in_dim = embed_dim if layer == 0 else 2 * H
        key, kf1, kf2, kf3, kf4, kb1, kb2, kb3, kb4 = jax.random.split(key, 9)
        wih_f = unif(kf1, (in_dim, 4 * H), stdv)          # W_ih^T fwd  (i,f,o,g)
        wih_b = unif(kb1, (in_dim, 4 * H), stdv)          # W_ih^T bwd
        whh_f = unif(kf2, (H, 4 * H), stdv)               # W_hh^T fwd
        whh_b = unif(kb2, (H, 4 * H), stdv)               # W_hh^T bwd
        b_f = unif(kf3, (1, 4 * H), stdv) + unif(kf4, (1, 4 * H), stdv)   # b_ih + b_hh
        b_b = unif(kb3, (1, 4 * H), stdv) + unif(kb4, (1, 4 * H), stdv)

        wih_cat = jnp.concatenate([wih_f, wih_b], axis=1).astype(w_dtype)  # (in_dim, 8H)
        if layer == 0:
            wih_list = [wih_cat]                          # single input (embeddings)
        else:
            wih_list = [wih_cat[:H], wih_cat[H:]]         # inputs are [y_fwd, y_bwd]

        # Block-diagonal recurrent weight: one (2H, 8H) matmul per step for both dirs.
        z = jnp.zeros((H, 4 * H), jnp.float32)
        whh_blk = jnp.concatenate(
            [jnp.concatenate([whh_f, z], axis=1),
             jnp.concatenate([z, whh_b], axis=1)], axis=0).astype(w_dtype)  # (2H, 8H)

        lstm.append(dict(
            wih_list=wih_list,
            whh_blk=whh_blk,
            b=jnp.concatenate([b_f, b_b], axis=1),        # (1, 8H) f32
        ))

    key, k1, k2 = jax.random.split(key, 3)
    fc_stdv = 1.0 / math.sqrt(2 * H)
    C = num_classes
    Cp = max(128, _round_up(C, 128))                      # lane-dense classifier output
    w_fc = unif(k1, (2 * H, C), fc_stdv)
    w_fc = jnp.pad(w_fc, ((0, 0), (0, Cp - C))).astype(w_dtype)
    b_fc = jnp.pad(unif(k2, (1, C), fc_stdv), ((0, 0), (0, Cp - C)))
    fc = dict(w_list=[w_fc[:H], w_fc[H:]],                # split rows: [fwd half, bwd half]
              b=b_fc)
    return {"lstm": lstm, "fc": fc, "hidden_dim": H, "num_classes": C}


# ----------------------------------------------------------------------------
if __name__ == "__main__":
    # TODO(synk): SelfAttention is constructed in the PyTorch module but never
    # used in MainModel.forward, so it is intentionally not implemented.
    B, T, EMBED, HIDDEN, LAYERS, NUM_CLASSES = 2, 8, 16, 32, 2, 4

    key = jax.random.PRNGKey(0)
    k_par, k_inp = jax.random.split(key)
    params = init_params(k_par, EMBED, HIDDEN, LAYERS, NUM_CLASSES)

    x = jax.random.normal(k_inp, (B, T, EMBED), jnp.float32)    # (B, T, embed_dim)
    lengths = np.array([8, 5], dtype=np.int32)                  # (B,) host-concrete

    out = main_model_forward(x, lengths, params)                # (B, max(lengths), C)
    out = jax.block_until_ready(out)

    assert out.shape == (B, int(lengths.max()), NUM_CLASSES)
    assert bool(jnp.all(jnp.isfinite(out)))
    # rows are log-probabilities -> each row sums (in prob space) to ~1
    row_sums = jnp.sum(jnp.exp(out), axis=-1)
    assert bool(jnp.allclose(row_sums, 1.0, atol=1e-4))
    # padded positions of sequence 1 (t >= 5) see zero encoder output -> the
    # classifier produces the same log_softmax(bias) row there
    assert bool(jnp.allclose(out[1, 5], out[1, 7], atol=1e-5))

    print("KERNEL_OK")
</pallas_src>

<mosaic_0001>
module attributes {stable_mosaic.version = 11 : i64} {
  func.func @kernel(%arg0: i32, %arg1: memref<64x16xbf16, #tpu.memory_space<vmem>>, %arg2: memref<16x256xbf16, #tpu.memory_space<vmem>>, %arg3: memref<1x256xf32, #tpu.memory_space<vmem>>, %arg4: memref<64x128xbf16, #tpu.memory_space<vmem>>, %arg5: memref<64x128xbf16, #tpu.memory_space<vmem>>) attributes {dimension_semantics = [#tpu.dimension_semantics<parallel>], iteration_bounds = array<i64: 1>, scalar_prefetch = 0 : i64, scratch_operands = 0 : i64, tpu.core_type = #tpu.core_type<tc>, window_params = [{transform_indices = @transform_0, window_bounds = array<i64: 64, 16>}, {pipeline_mode = #tpu.pipeline_mode<synchronous>, transform_indices = @transform_1, window_bounds = array<i64: 16, 256>}, {pipeline_mode = #tpu.pipeline_mode<synchronous>, transform_indices = @transform_2, window_bounds = array<i64: 1, 256>}, {transform_indices = @transform_3, window_bounds = array<i64: 64, 128>}, {transform_indices = @transform_4, window_bounds = array<i64: 64, 128>}]} {
    %c0 = arith.constant 0 : index
    %c0_0 = arith.constant 0 : index
    %0 = vector.load %arg2[%c0, %c0_0] : memref<16x256xbf16, #tpu.memory_space<vmem>>, vector<16x256xbf16>
    %c0_1 = arith.constant 0 : index
    %c0_2 = arith.constant 0 : index
    %1 = vector.load %arg1[%c0_1, %c0_2] : memref<64x16xbf16, #tpu.memory_space<vmem>>, vector<64x16xbf16>
    %cst = arith.constant dense<0.000000e+00> : vector<64x256xf32>
    %2 = tpu.matmul %1, %0, %cst {dimension_numbers = #tpu.dot_dimension_numbers<[1], [0], [0], [1], [0, 0, 1, 1], [], []>} : vector<64x16xbf16>, vector<16x256xbf16>, vector<64x256xf32> -> vector<64x256xf32>
    %c0_3 = arith.constant 0 : index
    %c0_4 = arith.constant 0 : index
    %3 = vector.load %arg3[%c0_3, %c0_4] : memref<1x256xf32, #tpu.memory_space<vmem>>, vector<1x256xf32>
    %4 = vector.broadcast %3 : vector<1x256xf32> to vector<64x256xf32>
    %5 = arith.addf %2, %4 : vector<64x256xf32>
    %6 = vector.extract_strided_slice %5 {offsets = [0, 0], sizes = [64, 128], strides = [1, 1]} : vector<64x256xf32> to vector<64x128xf32>
    %7 = arith.truncf %6 : vector<64x128xf32> to vector<64x128xbf16>
    %c0_5 = arith.constant 0 : index
    %c0_6 = arith.constant 0 : index
    %8 = vector.load %arg4[%c0_5, %c0_6] : memref<64x128xbf16, #tpu.memory_space<vmem>>, vector<64x128xbf16>
    tpu.vector_store %arg4[%c0_5, %c0_6], %7 {strides = array<i32>} : memref<64x128xbf16, #tpu.memory_space<vmem>>, vector<64x128xbf16>,
    %9 = vector.extract_strided_slice %5 {offsets = [0, 128], sizes = [64, 128], strides = [1, 1]} : vector<64x256xf32> to vector<64x128xf32>
    %10 = arith.truncf %9 : vector<64x128xf32> to vector<64x128xbf16>
    %c0_7 = arith.constant 0 : index
    %c0_8 = arith.constant 0 : index
    %11 = vector.load %arg5[%c0_7, %c0_8] : memref<64x128xbf16, #tpu.memory_space<vmem>>, vector<64x128xbf16>
    tpu.vector_store %arg5[%c0_7, %c0_8], %10 {strides = array<i32>} : memref<64x128xbf16, #tpu.memory_space<vmem>>, vector<64x128xbf16>,
    return
  }
  func.func @transform_0(%arg0: i32) -> (i32, i32) {
    %c0_i32 = arith.constant 0 : i32
    %c0_i32_0 = arith.constant 0 : i32
    return %arg0, %c0_i32 : i32, i32
  }
  func.func @transform_1(%arg0: i32) -> (i32, i32) {
    %c0_i32 = arith.constant 0 : i32
    %c0_i32_0 = arith.constant 0 : i32
    %c0_i32_1 = arith.constant 0 : i32
    return %c0_i32, %c0_i32_0 : i32, i32
  }
  func.func @transform_2(%arg0: i32) -> (i32, i32) {
    %c0_i32 = arith.constant 0 : i32
    %c0_i32_0 = arith.constant 0 : i32
    %c0_i32_1 = arith.constant 0 : i32
    return %c0_i32, %c0_i32_0 : i32, i32
  }
  func.func @transform_3(%arg0: i32) -> (i32, i32) {
    %c0_i32 = arith.constant 0 : i32
    %c0_i32_0 = arith.constant 0 : i32
    return %arg0, %c0_i32 : i32, i32
  }
  func.func @transform_4(%arg0: i32) -> (i32, i32) {
    %c0_i32 = arith.constant 0 : i32
    %c0_i32_0 = arith.constant 0 : i32
    return %arg0, %c0_i32 : i32, i32
  }
}

</mosaic_0001>

<bundles_post_ra>
// kernel: tpu_custom_call.1
= control target key start
LH: loop header
LB: loop body
LE: loop exit
PB: predicated region body
PF: predicated region fallthrough
CT: control target
= control target key end

     0   :  { %10 = vsyncpa [#allocation3], 0  ;;  %v415_v2 = vmov 0   ;;  %vm71_vm0 = vcmask 130048   ;;  %s472_s0 = inlined_call_operand.vmem [shape: bf16[64,16], index: 0, kind: input, shape index: {}]   ;;  %s473_s1 = inlined_call_operand.vmem [shape: bf16[16,256], index: 1, kind: input, shape index: {}]   ;;  %s474_s2 = inlined_call_operand.vmem [shape: f32[1,256], index: 2, kind: input, shape index: {}]   ;;  %s475_s3 = inlined_call_operand.hbm [shape: bf16[64,128], index: 3, kind: output, shape index: {0}]   ;;  %s476_s4 = inlined_call_operand.hbm [shape: bf16[64,128], index: 4, kind: output, shape index: {1}]  }
   0x1   :  { %v364_v0 = vld [vmem:[%s473_s1 + $0x4] ss:$8 sps:$4 sm:$0xff]   ;;  %v366_v1 = vld [vmem:[%s473_s1] ss:$8 sps:$4 sm:$0xff]   ;;  %116 = vmatprep.mubr.bf16.mxu0 %v415_v2  ;;  %136 = vmatprep.mubr.bf16.mxu1 %v415_v2  ;;  %v368_v4 = vld [vmem:[%s472_s0 + $0x10] sm:$0xff]  }
   0x2   :  { %98 = vmatprep.subr.bf16.mxu0 %v364_v0  ;;  %357 = vmatprep.subr.bf16.mxu1 %v364_v0  ;;  %v367_v3 = vld [vmem:[%s472_s0] sm:$0xff]  }
   0x3   :  { %99 = vmatpush1.bf16.msra.mxu0 %v366_v1  ;;  %358 = vmatpush1.bf16.msra.mxu1 %v366_v1 }
   0x4   :  { %11 = vsyncpa [#allocation5], 0  ;;  %v369_v5 = vld [vmem:[%s472_s0 + $0x8] sm:$0xff]   ;;  %v370_v6 = vld [vmem:[%s472_s0 + $0x18] sm:$0xff]   ;;  %v31_v7 = vlaneseq  ;;  %s416_s0 = smov [#allocation2]   ;;  %s417_s28 = smov [#allocation4]  }
   0x5   :  { %v29_v10 = vld [vmem:[%s474_s2] sm:$0x3]  ;;  %s242_s2 = sshll.u32 %s416_s0, 4  ;;  %s254_s29 = sshll.u32 %s417_s28, 4  ;;  %s243_s2 = int_to_ptr.vmem [resolvable:$true] %s242_s2  ;;  %s255_s29 = int_to_ptr.vmem [resolvable:$true] %s254_s29 }
   0x6   :  { %275 = vmatmul.mubr.msk.bf16.vlgmr.msra.gmra.mxu0 %vm71_vm0, %v367_v3  ;;  %277 = vmatmul.mubr.msk.bf16.vlgmr.msra.gmra.mxu1 %vm71_vm0, %v368_v4  ;;  %v32_v8 = vshrl.u32 %v31_v7, 7  ;;  %s371_s30 = scalar_lea.vmem %s243_s2, 512  ;;  %p376_p1 = scmp.lt.s32.totalorder %s243_s2, %s243_s2 }
   0x7   :  { %126 = vmatprep.mubr.bf16.mxu0 %v415_v2  ;;  %146 = vmatprep.mubr.bf16.mxu1 %v415_v2  ;;  %p372_p0 = scmp.ne.s32.totalorder %s243_s2, %s371_s30  ;;  %p377_p2 = scmp.lt.s32.totalorder %s371_s30, %s371_s30 }
   0x8   :  { %v33_v9 = vsub.s32 0, %v32_v8  ;;  %v37_v11 = vsub.s32 1, %v32_v8 }
   0x9   :  { %p378_p3 = por %p377_p2, %p376_p1 }
   0xa   :  { %v34_v14 = vrot.slane %v29_v10, %v33_v9  ;;  %v38_v15 = vrot.slane %v29_v10, %v37_v11 }
   0xb   :  { %p379_p4 = pnand %p378_p3, %p372_p0 }
   0xe   :  { %276 = vmatmul.mubr.msk.bf16.gmra.mxu0 %vm71_vm0, %v369_v5  ;;  %278 = vmatmul.mubr.msk.bf16.gmra.mxu1 %vm71_vm0, %v370_v6 }
  0xc6   :  { %v118_v12 = vpop.f32.mrf.mxu0  ;;  %v138_v13 = vpop.f32.mrf.mxu1 }
  0xc7   :  { %v119_v20 = vadd.f32 %v118_v12, %v34_v14  ;;  %v139_v21 = vadd.f32 %v138_v13, %v34_v14 }
  0xc8   :  { %v120_v16 = vpop.f32.mrf.mxu0  ;;  %v140_v17 = vpop.f32.mrf.mxu1 }
  0xc9   :  { %v121_v24 = vadd.f32 %v120_v16, %v38_v15  ;;  %v141_v25 = vadd.f32 %v140_v17, %v38_v15 }
  0xca   :  { %v122_v18 = vpop.f32.mrf.mxu0  ;;  %v142_v19 = vpop.f32.mrf.mxu1 }
  0xcb   :  { %v123_v22 = vadd.f32 %v122_v18, %v34_v14  ;;  %v143_v23 = vadd.f32 %v142_v19, %v34_v14 }
  0xcc   :  { %v124_v26 = vpop.f32.mrf.mxu0  ;;  %v144_v27 = vpop.f32.mrf.mxu1 }
  0xcd   :  { %v314_v28 = vpack.c.bf16 %v123_v22, %v119_v20  ;;  %v324_v29 = vpack.c.bf16 %v143_v23, %v139_v21  ;;  %v125_v30 = vadd.f32 %v124_v26, %v38_v15  ;;  %v145_v31 = vadd.f32 %v144_v27, %v38_v15 }
  0xce   :  { %v128_v32 = vpop.f32.mrf.mxu0  ;;  %v148_v33 = vpop.f32.mrf.mxu1 }
  0xcf   :  { %315 = vst [vmem:[#allocation2] sm:$0xff] %v314_v28   ;;  %352 = vst [vmem:[#allocation2 + $0x10] sm:$0xff] %v324_v29   ;;  %v334_v34 = vpack.c.bf16 %v125_v30, %v121_v24  ;;  %v344_v35 = vpack.c.bf16 %v145_v31, %v141_v25  ;;  %v129_v40 = vadd.f32 %v128_v32, %v34_v14 }
  0xd0   :  { %v130_v36 = vpop.f32.mrf.mxu0  ;;  %v150_v37 = vpop.f32.mrf.mxu1  ;;  %v149_v41 = vadd.f32 %v148_v33, %v34_v14 }
  0xd1   :  { %335 = vst [vmem:[#allocation4] sm:$0xff] %v334_v34   ;;  %355 = vst [vmem:[#allocation4 + $0x10] sm:$0xff] %v344_v35   ;;  %v131_v44 = vadd.f32 %v130_v36, %v38_v15  ;;  %v151_v45 = vadd.f32 %v150_v37, %v38_v15 }
  0xd2   :  { %v132_v38 = vpop.f32.mrf.mxu0  ;;  %v152_v39 = vpop.f32.mrf.mxu1 }
  0xd3   :  { %v133_v42 = vadd.f32 %v132_v38, %v34_v14  ;;  %v153_v43 = vadd.f32 %v152_v39, %v34_v14 }
  0xd4   :  { %v134_v46 = vpop.f32.mrf.mxu0  ;;  %v154_v47 = vpop.f32.mrf.mxu1 }
  0xd5   :  { %v319_v48 = vpack.c.bf16 %v133_v42, %v129_v40  ;;  %v329_v49 = vpack.c.bf16 %v153_v43, %v149_v41  ;;  %v135_v50 = vadd.f32 %v134_v46, %v38_v15  ;;  %v155_v51 = vadd.f32 %v154_v47, %v38_v15 }
  0xd7   :  { %351 = vst [vmem:[#allocation2 + $0x8] sm:$0xff] %v319_v48   ;;  %353 = vst [vmem:[#allocation2 + $0x18] sm:$0xff] %v329_v49   ;;  %v339_v52 = vpack.c.bf16 %v135_v50, %v131_v44  ;;  %v349_v53 = vpack.c.bf16 %v155_v51, %v151_v45 }
  0xd8   :  { %382 = shalt.err (!%p379_p4)
}
  0xd9   :  { %s418_s5 = smov 64   ;;  %s419_s6 = smov 4   ;;  %354 = vst [vmem:[#allocation4 + $0x8] sm:$0xff] %v339_v52   ;;  %356 = vst [vmem:[#allocation4 + $0x18] sm:$0xff] %v349_v53  }
  0xda   :  { %248 = dma.vmem_to_hbm [thread:$0]  %s243_s2, 512, %s475_s3, [#allocation3], %s418_s5, %s418_s5, %s419_s6  }
  0xdb   :  { %s391_s9 = scalar_lea.vmem %s255_s29, 512  ;;  %p396_p6 = scmp.lt.s32.totalorder %s255_s29, %s255_s29 }
  0xdc   :  { %p392_p5 = scmp.ne.s32.totalorder %s255_s29, %s391_s9  ;;  %p397_p7 = scmp.lt.s32.totalorder %s391_s9, %s391_s9 }
  0xde   :  { %p398_p8 = por %p397_p7, %p396_p6 }
  0xe0   :  { %p399_p9 = pnand %p398_p8, %p392_p5 }
  0xe2   :  { %402 = shalt.err (!%p399_p9)
}
  0xe3   :  { %260 = dma.vmem_to_hbm [thread:$0]  %s255_s29, 512, %s476_s4, [#allocation5], %s418_s5, %s418_s5, %s419_s6  }
  0xe4   :  { %411 = dma.done.wait [#allocation3], 512  }
  0xe5   :  { %412 = vsyncadd [#allocation3], 4294966784 }
  0xe6   :  { %413 = dma.done.wait [#allocation5], 512  }
  0xe7   :  { %414 = vsyncadd [#allocation5], 4294966784 }
  0xe8   :  { %267 = vsyncpa [#allocation3], 1 }
  0xe9   :  { %268 = vsyncpa [#allocation5], 1 }

</bundles_post_ra>
